<compile_context>
chip_gen: v7x
topology: tpu7x:2x2x1
jax: 0.10.0
libtpu: 0.0.40
codegen_flags: <defaults>
</compile_context>

<pallas_src>
import functools

import numpy as np

import jax
import jax.numpy as jnp
from jax.experimental import pallas as pl
from jax.experimental.pallas import tpu as pltpu


# ----------------------------------------------------------------------------
# One-time parameter packing (off the hot path).
# ----------------------------------------------------------------------------
def pack_params(params):
    """Pack raw Q-network weights into the MXU-friendly 'shifted-block' form.
    Every layout permutation (conv taps incl. x-padding, channel ordering,
    PyTorch NCHW flatten for fc3) happens here exactly once.  The big matmul
    weights are stored bf16 (the MXU truncates f32 operands to bf16 at DEFAULT
    precision anyway); accumulation stays f32 in the kernel."""
    w1 = np.asarray(params["w1"], np.float32)   # (3,3,4,8)   HWIO
    w2 = np.asarray(params["w2"], np.float32)   # (3,3,8,16)  HWIO
    w3 = np.asarray(params["w3"], np.float32)   # (1024, 32)  rows = co*64+y*8+x

    # conv1 (stride 1): m1[dy][c*16 + xi, co*16 + xo] = w1[dy, dx, c, co]
    # with xi = xo + dx - 1; out-of-range xi (x padding) stays a zero block.
    m1 = np.zeros((3, 64, 128), np.float32)
    for dy in range(3):
        for dx in range(3):
            for xo in range(16):
                xi = xo + dx - 1
                if 0 <= xi < 16:
                    m1[dy, xi::16, xo::16] = w1[dy, dx]        # (4, 8) block

    # conv2 (stride 2): m2[dy][ci*16 + xi, co*8 + xp] = w2[dy, dx, ci, co]
    # with xi = 2*xp + dx - 1; out-of-range xi (x padding) stays zero.
    m2 = np.zeros((3, 128, 128), np.float32)
    for dy in range(3):
        for dx in range(3):
            for xp in range(8):
                xi = 2 * xp + dx - 1
                if 0 <= xi < 16:
                    m2[dy, xi::16, xp::8] = w2[dy, dx]         # (8, 16) block

    # fc3: permute w3 rows from PyTorch NCHW flatten (co, y', x') into the
    # kernel's per-y' (co*8 + x') lane layout -> (8, 128, 32).
    w3p = np.transpose(w3.reshape(16, 8, 8, 32), (1, 0, 2, 3)).reshape(8, 128, 32)

    return {
        "m1": jnp.asarray(m1, jnp.bfloat16),
        "b1": jnp.asarray(np.repeat(np.asarray(params["b1"], np.float32), 16)[None, :]),
        "m2": jnp.asarray(m2, jnp.bfloat16),
        "b2": jnp.asarray(np.repeat(np.asarray(params["b2"], np.float32), 8)[None, :]),
        "w3p": jnp.asarray(w3p, jnp.bfloat16),
        "b3": jnp.asarray(np.asarray(params["b3"], np.float32)[None, :]),
        "w4": jnp.asarray(np.asarray(params["w4"], np.float32)),
        "b4": jnp.asarray(np.asarray(params["b4"], np.float32)[None, :]),
    }


def _prep_obs(obs_nchw):
    """NCHW obs -> y-major, lane-dense, y-padded conv1 input (pure layout
    plumbing, done by XLA outside the kernel on ~10 KB):
      row  = y_pad * B + b     (y_pad = y + 2; rows [0,2B) and [18B,19B) = 0)
      lane = c * 16 + x        (64 lanes)
    """
    b, c, h, w = obs_nchw.shape                       # (B, 4, 16, 16)
    x = jnp.transpose(obs_nchw, (2, 0, 1, 3)).reshape(h * b, c * w)
    return jnp.pad(x, ((2 * b, b), (0, 0)))           # (19B, 64)


# ----------------------------------------------------------------------------
# The fused Pallas kernel: conv1 + conv2 + fc3 + fc4 (+ greedy one-hot action).
# ----------------------------------------------------------------------------
def _dqn_kernel(x1_ref, m1_ref, b1_ref, m2_ref, b2_ref,
                w3p_ref, b3_ref, w4_ref, b4_ref,
                q_ref, act_ref, y1_ref, *, batch):
    B = batch
    n1 = 17 * B          # conv1 output rows: row (1 + y1) * B + b, y1 in [-1, 15]
    n2 = 15 * B          # conv2 window-start rows: row s * B + b, s in [0, 14]

    # ---- conv1 (4->8, s1, p1): 3 accumulated MXU matmuls over dy-shifted,
    # contiguous row windows of the y-padded input (shift = dy * B).
    acc1 = jnp.zeros((n1, 128), jnp.float32)
    for dy in range(3):
        lhs = x1_ref[pl.ds(dy * B, n1), :].astype(jnp.bfloat16)     # (17B, 64)
        acc1 = acc1 + jnp.dot(lhs, m1_ref[dy],
                              preferred_element_type=jnp.float32)
    # bias + ReLU; only rows [0, B) (the y = -1 pad that conv2 reads) must be
    # zeroed -- all other rows are real outputs.  Stored bf16 (next MXU stage
    # truncates to bf16 anyway).
    row = jax.lax.broadcasted_iota(jnp.int32, (n1, 1), 0)
    y1 = jnp.where(row >= B, jnp.maximum(acc1 + b1_ref[...], 0.0), 0.0)
    y1_ref[...] = y1.astype(jnp.bfloat16)

    # ---- conv2 (8->16, s2, p1), computed stride-1 over window starts s so the
    # three dy taps are contiguous shifted reads; only even s (= 2*y') rows are
    # consumed by fc3, the odd-s rows are cheap unused MXU filler.
    acc2 = jnp.zeros((n2, 128), jnp.float32)
    for dy in range(3):
        acc2 = acc2 + jnp.dot(y1_ref[pl.ds(dy * B, n2), :], m2_ref[dy],
                              preferred_element_type=jnp.float32)
    a2 = jnp.maximum(acc2 + b2_ref[...], 0.0).astype(jnp.bfloat16)   # (15B, 128)

    # ---- fc3 (1024 -> 32): 8 accumulated matmuls, each on the contiguous
    # (B, 128) block of window start s = 2*y' (the NCHW flatten is in w3p).
    acc3 = jnp.zeros((B, 32), jnp.float32)
    for y2 in range(8):
        blk = a2[2 * y2 * B:2 * y2 * B + B, :]                       # (B, 128)
        acc3 = acc3 + jnp.dot(blk, w3p_ref[y2],
                              preferred_element_type=jnp.float32)
    a3 = jnp.maximum(acc3 + b3_ref[...], 0.0)                        # (B, 32)

    # ---- fc4 (32 -> 2) + greedy one-hot action, one batched store each.
    q = jnp.dot(a3, w4_ref[...],
                preferred_element_type=jnp.float32) + b4_ref[...]    # (B, 2)
    q_ref[...] = q
    ge = (q[:, 0:1] >= q[:, 1:2]).astype(jnp.float32)   # torch.max -> first idx on ties
    lane = jax.lax.broadcasted_iota(jnp.int32, (B, 2), 1)
    act_ref[...] = jnp.where(lane == 0, ge, 1.0 - ge)


def _dqn_pallas(packed, obs_nchw):
    """Run the fused forward kernel. Returns (q, one_hot_greedy_action)."""
    batch = obs_nchw.shape[0]
    assert obs_nchw.shape[1:] == (4, 16, 16)
    x1 = _prep_obs(obs_nchw)                                   # (19B, 64) f32

    operands = (x1, packed["m1"], packed["b1"], packed["m2"], packed["b2"],
                packed["w3p"], packed["b3"], packed["w4"], packed["b4"])

    flops = 2 * (3 * (17 * batch) * 64 * 128
                 + 3 * (15 * batch) * 128 * 128
                 + 8 * batch * 128 * 32
                 + batch * 32 * 2)
    bytes_accessed = int(sum(int(np.prod(a.shape)) * a.dtype.itemsize
                             for a in operands) + 2 * batch * 2 * 4)

    vmem = pl.BlockSpec(memory_space=pltpu.MemorySpace.VMEM)
    q, act = pl.pallas_call(
        functools.partial(_dqn_kernel, batch=batch),
        out_shape=(jax.ShapeDtypeStruct((batch, 2), jnp.float32),
                   jax.ShapeDtypeStruct((batch, 2), jnp.float32)),
        in_specs=[vmem] * len(operands),
        out_specs=(vmem, vmem),
        scratch_shapes=[
            pltpu.VMEM((17 * batch, 128), jnp.bfloat16),   # conv1 output (y-major)
        ],
        cost_estimate=pl.CostEstimate(flops=int(flops), transcendentals=0,
                                      bytes_accessed=bytes_accessed),
    )(*operands)
    return q, act


# ----------------------------------------------------------------------------
# Public wrappers mirroring the PyTorch module.
# ----------------------------------------------------------------------------
def dqn_forward(packed, obs_nchw):
    """DQN.forward(obs) == model(obs): NCHW obs -> Q-values of shape (B, 2)."""
    q, _ = _dqn_pallas(packed, obs_nchw)
    return q


def get_optim_action(packed, obs_nchw):
    """Mirrors DQN.get_optim_action: argmax over dim=1 -> one-hot action.
    The one-hot action is produced inside the fused kernel epilogue."""
    q, act = _dqn_pallas(packed, obs_nchw)
    return act, q


# ----------------------------------------------------------------------------
# Raw (unpacked) parameters and a pure-JAX reference for correctness checking.
# ----------------------------------------------------------------------------
def init_params(key):
    ks = jax.random.split(key, 8)
    s = 0.05
    return {
        "w1": jax.random.normal(ks[0], (3, 3, 4, 8), jnp.float32) * s,   # HWIO
        "b1": jax.random.normal(ks[1], (8,), jnp.float32) * s,
        "w2": jax.random.normal(ks[2], (3, 3, 8, 16), jnp.float32) * s,
        "b2": jax.random.normal(ks[3], (16,), jnp.float32) * s,
        "w3": jax.random.normal(ks[4], (16 * 8 * 8, 32), jnp.float32) * s,
        "b3": jax.random.normal(ks[5], (32,), jnp.float32) * s,
        "w4": jax.random.normal(ks[6], (32, 2), jnp.float32) * s,
        "b4": jax.random.normal(ks[7], (2,), jnp.float32) * s,
    }


def reference_forward(params, obs_nchw):
    x = jnp.transpose(obs_nchw, (0, 2, 3, 1))

    def conv(x, w, b, stride, pad):
        y = jax.lax.conv_general_dilated(
            x, w, window_strides=(stride, stride),
            padding=[(pad, pad), (pad, pad)],
            dimension_numbers=("NHWC", "HWIO", "NHWC"))
        return jax.nn.relu(y + b)

    x = conv(x, params["w1"], params["b1"], 1, 1)
    x = conv(x, params["w2"], params["b2"], 2, 1)
    x = jnp.transpose(x, (0, 3, 1, 2)).reshape(x.shape[0], -1)   # NCHW flatten
    x = jax.nn.relu(x @ params["w3"] + params["b3"])
    return x @ params["w4"] + params["b4"]


if __name__ == "__main__":
    key = jax.random.PRNGKey(0)
    k_params, k_obs = jax.random.split(key)

    params = init_params(k_params)
    packed = pack_params(params)                       # one-time, off the hot path
    obs = jax.random.normal(k_obs, (2, 4, 16, 16), jnp.float32)   # NCHW, B=2

    action, q = jax.jit(get_optim_action)(packed, obs)
    q = jax.block_until_ready(q)
    action = jax.block_until_ready(action)

    q_ref = reference_forward(params, obs)
    assert q.shape == (2, 2) and action.shape == (2, 2)
    # Tolerance sized for bf16-packed weights / bf16 MXU operands (~2^-9
    # relative per layer); layout/indexing bugs would show up as O(0.1) errors.
    assert jnp.allclose(q, q_ref, atol=5e-3, rtol=5e-3)
    # The in-kernel greedy action must match argmax of the kernel's own Q.
    act_chk = jax.nn.one_hot(jnp.argmax(q, axis=1), 2, dtype=jnp.float32)
    assert jnp.allclose(action, act_chk)

    print("KERNEL_OK")
</pallas_src>

<mosaic_0001>
module attributes {stable_mosaic.version = 11 : i64} {
  func.func @_dqn_kernel(%arg0: memref<38x64xf32, #tpu.memory_space<vmem>>, %arg1: memref<3x64x128xbf16, #tpu.memory_space<vmem>>, %arg2: memref<1x128xf32, #tpu.memory_space<vmem>>, %arg3: memref<3x128x128xbf16, #tpu.memory_space<vmem>>, %arg4: memref<1x128xf32, #tpu.memory_space<vmem>>, %arg5: memref<8x128x32xbf16, #tpu.memory_space<vmem>>, %arg6: memref<1x32xf32, #tpu.memory_space<vmem>>, %arg7: memref<32x2xf32, #tpu.memory_space<vmem>>, %arg8: memref<1x2xf32, #tpu.memory_space<vmem>>, %arg9: memref<2x2xf32, #tpu.memory_space<vmem>>, %arg10: memref<2x2xf32, #tpu.memory_space<vmem>>, %arg11: memref<34x128xbf16, #tpu.memory_space<vmem>>) attributes {dimension_semantics = [], scalar_prefetch = 0 : i64, scratch_operands = 1 : i64, tpu.core_type = #tpu.core_type<tc>} {
    %cst = arith.constant 0.000000e+00 : f32
    %0 = vector.broadcast %cst : f32 to vector<34x128xf32>
    %c0 = arith.constant 0 : index
    %c0_0 = arith.constant 0 : index
    %1 = vector.load %arg0[%c0, %c0_0] : memref<38x64xf32, #tpu.memory_space<vmem>>, vector<34x64xf32>
    %2 = arith.truncf %1 : vector<34x64xf32> to vector<34x64xbf16>
    %c0_1 = arith.constant 0 : index
    %c0_2 = arith.constant 0 : index
    %c0_3 = arith.constant 0 : index
    %3 = vector.load %arg1[%c0_1, %c0_2, %c0_3] : memref<3x64x128xbf16, #tpu.memory_space<vmem>>, vector<1x64x128xbf16>
    %4 = vector.shape_cast %3 : vector<1x64x128xbf16> to vector<64x128xbf16>
    %cst_4 = arith.constant dense<0.000000e+00> : vector<34x128xf32>
    %5 = tpu.matmul %2, %4, %cst_4 {dimension_numbers = #tpu.dot_dimension_numbers<[1], [0], [0], [1], [0, 0, 1, 1], [], []>} : vector<34x64xbf16>, vector<64x128xbf16>, vector<34x128xf32> -> vector<34x128xf32>
    %6 = arith.addf %0, %5 : vector<34x128xf32>
    %c2 = arith.constant 2 : index
    %c0_5 = arith.constant 0 : index
    %7 = vector.load %arg0[%c2, %c0_5] : memref<38x64xf32, #tpu.memory_space<vmem>>, vector<34x64xf32>
    %8 = arith.truncf %7 : vector<34x64xf32> to vector<34x64xbf16>
    %c1 = arith.constant 1 : index
    %c0_6 = arith.constant 0 : index
    %c0_7 = arith.constant 0 : index
    %9 = vector.load %arg1[%c1, %c0_6, %c0_7] : memref<3x64x128xbf16, #tpu.memory_space<vmem>>, vector<1x64x128xbf16>
    %10 = vector.shape_cast %9 : vector<1x64x128xbf16> to vector<64x128xbf16>
    %cst_8 = arith.constant dense<0.000000e+00> : vector<34x128xf32>
    %11 = tpu.matmul %8, %10, %cst_8 {dimension_numbers = #tpu.dot_dimension_numbers<[1], [0], [0], [1], [0, 0, 1, 1], [], []>} : vector<34x64xbf16>, vector<64x128xbf16>, vector<34x128xf32> -> vector<34x128xf32>
    %12 = arith.addf %6, %11 : vector<34x128xf32>
    %c4 = arith.constant 4 : index
    %c0_9 = arith.constant 0 : index
    %13 = vector.load %arg0[%c4, %c0_9] : memref<38x64xf32, #tpu.memory_space<vmem>>, vector<34x64xf32>
    %14 = arith.truncf %13 : vector<34x64xf32> to vector<34x64xbf16>
    %c2_10 = arith.constant 2 : index
    %c0_11 = arith.constant 0 : index
    %c0_12 = arith.constant 0 : index
    %15 = vector.load %arg1[%c2_10, %c0_11, %c0_12] : memref<3x64x128xbf16, #tpu.memory_space<vmem>>, vector<1x64x128xbf16>
    %16 = vector.shape_cast %15 : vector<1x64x128xbf16> to vector<64x128xbf16>
    %cst_13 = arith.constant dense<0.000000e+00> : vector<34x128xf32>
    %17 = tpu.matmul %14, %16, %cst_13 {dimension_numbers = #tpu.dot_dimension_numbers<[1], [0], [0], [1], [0, 0, 1, 1], [], []>} : vector<34x64xbf16>, vector<64x128xbf16>, vector<34x128xf32> -> vector<34x128xf32>
    %18 = arith.addf %12, %17 : vector<34x128xf32>
    %19 = tpu.iota {dimensions = array<i32: 0>} : vector<34x1xi32>
    %c2_i32 = arith.constant 2 : i32
    %20 = vector.broadcast %c2_i32 : i32 to vector<34x1xi32>
    %21 = arith.cmpi sge, %19, %20 : vector<34x1xi32>
    %c0_14 = arith.constant 0 : index
    %c0_15 = arith.constant 0 : index
    %22 = vector.load %arg2[%c0_14, %c0_15] : memref<1x128xf32, #tpu.memory_space<vmem>>, vector<1x128xf32>
    %23 = vector.broadcast %22 : vector<1x128xf32> to vector<34x128xf32>
    %24 = arith.addf %18, %23 : vector<34x128xf32>
    %cst_16 = arith.constant 0.000000e+00 : f32
    %25 = vector.broadcast %cst_16 : f32 to vector<34x128xf32>
    %26 = arith.maximumf %24, %25 : vector<34x128xf32>
    %cst_17 = arith.constant 0.000000e+00 : f32
    %27 = vector.shape_cast %21 : vector<34x1xi1> to vector<34x1xi1>
    %28 = vector.broadcast %27 : vector<34x1xi1> to vector<34x128xi1>
    %29 = vector.broadcast %cst_17 : f32 to vector<34x128xf32>
    %30 = arith.select %28, %26, %29 : vector<34x128xi1>, vector<34x128xf32>
    %31 = arith.truncf %30 : vector<34x128xf32> to vector<34x128xbf16>
    %c0_18 = arith.constant 0 : index
    %c0_19 = arith.constant 0 : index
    %32 = vector.load %arg11[%c0_18, %c0_19] : memref<34x128xbf16, #tpu.memory_space<vmem>>, vector<34x128xbf16>
    tpu.vector_store %arg11[%c0_18, %c0_19], %31 {strides = array<i32>} : memref<34x128xbf16, #tpu.memory_space<vmem>>, vector<34x128xbf16>,
    %cst_20 = arith.constant 0.000000e+00 : f32
    %33 = vector.broadcast %cst_20 : f32 to vector<30x128xf32>
    %c0_21 = arith.constant 0 : index
    %c0_22 = arith.constant 0 : index
    %34 = vector.load %arg11[%c0_21, %c0_22] : memref<34x128xbf16, #tpu.memory_space<vmem>>, vector<30x128xbf16>
    %c0_23 = arith.constant 0 : index
    %c0_24 = arith.constant 0 : index
    %c0_25 = arith.constant 0 : index
    %35 = vector.load %arg3[%c0_23, %c0_24, %c0_25] : memref<3x128x128xbf16, #tpu.memory_space<vmem>>, vector<1x128x128xbf16>
    %36 = vector.shape_cast %35 : vector<1x128x128xbf16> to vector<128x128xbf16>
    %cst_26 = arith.constant dense<0.000000e+00> : vector<30x128xf32>
    %37 = tpu.matmul %34, %36, %cst_26 {dimension_numbers = #tpu.dot_dimension_numbers<[1], [0], [0], [1], [0, 0, 1, 1], [], []>} : vector<30x128xbf16>, vector<128x128xbf16>, vector<30x128xf32> -> vector<30x128xf32>
    %38 = arith.addf %33, %37 : vector<30x128xf32>
    %c2_27 = arith.constant 2 : index
    %c0_28 = arith.constant 0 : index
    %39 = vector.load %arg11[%c2_27, %c0_28] : memref<34x128xbf16, #tpu.memory_space<vmem>>, vector<30x128xbf16>
    %c1_29 = arith.constant 1 : index
    %c0_30 = arith.constant 0 : index
    %c0_31 = arith.constant 0 : index
    %40 = vector.load %arg3[%c1_29, %c0_30, %c0_31] : memref<3x128x128xbf16, #tpu.memory_space<vmem>>, vector<1x128x128xbf16>
    %41 = vector.shape_cast %40 : vector<1x128x128xbf16> to vector<128x128xbf16>
    %cst_32 = arith.constant dense<0.000000e+00> : vector<30x128xf32>
    %42 = tpu.matmul %39, %41, %cst_32 {dimension_numbers = #tpu.dot_dimension_numbers<[1], [0], [0], [1], [0, 0, 1, 1], [], []>} : vector<30x128xbf16>, vector<128x128xbf16>, vector<30x128xf32> -> vector<30x128xf32>
    %43 = arith.addf %38, %42 : vector<30x128xf32>
    %c4_33 = arith.constant 4 : index
    %c0_34 = arith.constant 0 : index
    %44 = vector.load %arg11[%c4_33, %c0_34] : memref<34x128xbf16, #tpu.memory_space<vmem>>, vector<30x128xbf16>
    %c2_35 = arith.constant 2 : index
    %c0_36 = arith.constant 0 : index
    %c0_37 = arith.constant 0 : index
    %45 = vector.load %arg3[%c2_35, %c0_36, %c0_37] : memref<3x128x128xbf16, #tpu.memory_space<vmem>>, vector<1x128x128xbf16>
    %46 = vector.shape_cast %45 : vector<1x128x128xbf16> to vector<128x128xbf16>
    %cst_38 = arith.constant dense<0.000000e+00> : vector<30x128xf32>
    %47 = tpu.matmul %44, %46, %cst_38 {dimension_numbers = #tpu.dot_dimension_numbers<[1], [0], [0], [1], [0, 0, 1, 1], [], []>} : vector<30x128xbf16>, vector<128x128xbf16>, vector<30x128xf32> -> vector<30x128xf32>
    %48 = arith.addf %43, %47 : vector<30x128xf32>
    %c0_39 = arith.constant 0 : index
    %c0_40 = arith.constant 0 : index
    %49 = vector.load %arg4[%c0_39, %c0_40] : memref<1x128xf32, #tpu.memory_space<vmem>>, vector<1x128xf32>
    %50 = vector.broadcast %49 : vector<1x128xf32> to vector<30x128xf32>
    %51 = arith.addf %48, %50 : vector<30x128xf32>
    %cst_41 = arith.constant 0.000000e+00 : f32
    %52 = vector.broadcast %cst_41 : f32 to vector<30x128xf32>
    %53 = arith.maximumf %51, %52 : vector<30x128xf32>
    %54 = arith.truncf %53 : vector<30x128xf32> to vector<30x128xbf16>
    %cst_42 = arith.constant 0.000000e+00 : f32
    %55 = vector.broadcast %cst_42 : f32 to vector<2x32xf32>
    %56 = vector.extract_strided_slice %54 {offsets = [0, 0], sizes = [2, 128], strides = [1, 1]} : vector<30x128xbf16> to vector<2x128xbf16>
    %c0_43 = arith.constant 0 : index
    %c0_44 = arith.constant 0 : index
    %c0_45 = arith.constant 0 : index
    %57 = vector.load %arg5[%c0_43, %c0_44, %c0_45] : memref<8x128x32xbf16, #tpu.memory_space<vmem>>, vector<1x128x32xbf16>
    %58 = vector.shape_cast %57 : vector<1x128x32xbf16> to vector<128x32xbf16>
    %cst_46 = arith.constant dense<0.000000e+00> : vector<2x32xf32>
    %59 = tpu.matmul %56, %58, %cst_46 {dimension_numbers = #tpu.dot_dimension_numbers<[1], [0], [0], [1], [0, 0, 1, 1], [], []>} : vector<2x128xbf16>, vector<128x32xbf16>, vector<2x32xf32> -> vector<2x32xf32>
    %60 = arith.addf %55, %59 : vector<2x32xf32>
    %61 = vector.extract_strided_slice %54 {offsets = [4, 0], sizes = [2, 128], strides = [1, 1]} : vector<30x128xbf16> to vector<2x128xbf16>
    %c1_47 = arith.constant 1 : index
    %c0_48 = arith.constant 0 : index
    %c0_49 = arith.constant 0 : index
    %62 = vector.load %arg5[%c1_47, %c0_48, %c0_49] : memref<8x128x32xbf16, #tpu.memory_space<vmem>>, vector<1x128x32xbf16>
    %63 = vector.shape_cast %62 : vector<1x128x32xbf16> to vector<128x32xbf16>
    %cst_50 = arith.constant dense<0.000000e+00> : vector<2x32xf32>
    %64 = tpu.matmul %61, %63, %cst_50 {dimension_numbers = #tpu.dot_dimension_numbers<[1], [0], [0], [1], [0, 0, 1, 1], [], []>} : vector<2x128xbf16>, vector<128x32xbf16>, vector<2x32xf32> -> vector<2x32xf32>
    %65 = arith.addf %60, %64 : vector<2x32xf32>
    %66 = vector.extract_strided_slice %54 {offsets = [8, 0], sizes = [2, 128], strides = [1, 1]} : vector<30x128xbf16> to vector<2x128xbf16>
    %c2_51 = arith.constant 2 : index
    %c0_52 = arith.constant 0 : index
    %c0_53 = arith.constant 0 : index
    %67 = vector.load %arg5[%c2_51, %c0_52, %c0_53] : memref<8x128x32xbf16, #tpu.memory_space<vmem>>, vector<1x128x32xbf16>
    %68 = vector.shape_cast %67 : vector<1x128x32xbf16> to vector<128x32xbf16>
    %cst_54 = arith.constant dense<0.000000e+00> : vector<2x32xf32>
    %69 = tpu.matmul %66, %68, %cst_54 {dimension_numbers = #tpu.dot_dimension_numbers<[1], [0], [0], [1], [0, 0, 1, 1], [], []>} : vector<2x128xbf16>, vector<128x32xbf16>, vector<2x32xf32> -> vector<2x32xf32>
    %70 = arith.addf %65, %69 : vector<2x32xf32>
    %71 = vector.extract_strided_slice %54 {offsets = [12, 0], sizes = [2, 128], strides = [1, 1]} : vector<30x128xbf16> to vector<2x128xbf16>
    %c3 = arith.constant 3 : index
    %c0_55 = arith.constant 0 : index
    %c0_56 = arith.constant 0 : index
    %72 = vector.load %arg5[%c3, %c0_55, %c0_56] : memref<8x128x32xbf16, #tpu.memory_space<vmem>>, vector<1x128x32xbf16>
    %73 = vector.shape_cast %72 : vector<1x128x32xbf16> to vector<128x32xbf16>
    %cst_57 = arith.constant dense<0.000000e+00> : vector<2x32xf32>
    %74 = tpu.matmul %71, %73, %cst_57 {dimension_numbers = #tpu.dot_dimension_numbers<[1], [0], [0], [1], [0, 0, 1, 1], [], []>} : vector<2x128xbf16>, vector<128x32xbf16>, vector<2x32xf32> -> vector<2x32xf32>
    %75 = arith.addf %70, %74 : vector<2x32xf32>
    %76 = vector.extract_strided_slice %54 {offsets = [16, 0], sizes = [2, 128], strides = [1, 1]} : vector<30x128xbf16> to vector<2x128xbf16>
    %c4_58 = arith.constant 4 : index
    %c0_59 = arith.constant 0 : index
    %c0_60 = arith.constant 0 : index
    %77 = vector.load %arg5[%c4_58, %c0_59, %c0_60] : memref<8x128x32xbf16, #tpu.memory_space<vmem>>, vector<1x128x32xbf16>
    %78 = vector.shape_cast %77 : vector<1x128x32xbf16> to vector<128x32xbf16>
    %cst_61 = arith.constant dense<0.000000e+00> : vector<2x32xf32>
    %79 = tpu.matmul %76, %78, %cst_61 {dimension_numbers = #tpu.dot_dimension_numbers<[1], [0], [0], [1], [0, 0, 1, 1], [], []>} : vector<2x128xbf16>, vector<128x32xbf16>, vector<2x32xf32> -> vector<2x32xf32>
    %80 = arith.addf %75, %79 : vector<2x32xf32>
    %81 = vector.extract_strided_slice %54 {offsets = [20, 0], sizes = [2, 128], strides = [1, 1]} : vector<30x128xbf16> to vector<2x128xbf16>
    %c5 = arith.constant 5 : index
    %c0_62 = arith.constant 0 : index
    %c0_63 = arith.constant 0 : index
    %82 = vector.load %arg5[%c5, %c0_62, %c0_63] : memref<8x128x32xbf16, #tpu.memory_space<vmem>>, vector<1x128x32xbf16>
    %83 = vector.shape_cast %82 : vector<1x128x32xbf16> to vector<128x32xbf16>
    %cst_64 = arith.constant dense<0.000000e+00> : vector<2x32xf32>
    %84 = tpu.matmul %81, %83, %cst_64 {dimension_numbers = #tpu.dot_dimension_numbers<[1], [0], [0], [1], [0, 0, 1, 1], [], []>} : vector<2x128xbf16>, vector<128x32xbf16>, vector<2x32xf32> -> vector<2x32xf32>
    %85 = arith.addf %80, %84 : vector<2x32xf32>
    %86 = vector.extract_strided_slice %54 {offsets = [24, 0], sizes = [2, 128], strides = [1, 1]} : vector<30x128xbf16> to vector<2x128xbf16>
    %c6 = arith.constant 6 : index
    %c0_65 = arith.constant 0 : index
    %c0_66 = arith.constant 0 : index
    %87 = vector.load %arg5[%c6, %c0_65, %c0_66] : memref<8x128x32xbf16, #tpu.memory_space<vmem>>, vector<1x128x32xbf16>
    %88 = vector.shape_cast %87 : vector<1x128x32xbf16> to vector<128x32xbf16>
    %cst_67 = arith.constant dense<0.000000e+00> : vector<2x32xf32>
    %89 = tpu.matmul %86, %88, %cst_67 {dimension_numbers = #tpu.dot_dimension_numbers<[1], [0], [0], [1], [0, 0, 1, 1], [], []>} : vector<2x128xbf16>, vector<128x32xbf16>, vector<2x32xf32> -> vector<2x32xf32>
    %90 = arith.addf %85, %89 : vector<2x32xf32>
    %91 = vector.extract_strided_slice %54 {offsets = [28, 0], sizes = [2, 128], strides = [1, 1]} : vector<30x128xbf16> to vector<2x128xbf16>
    %c7 = arith.constant 7 : index
    %c0_68 = arith.constant 0 : index
    %c0_69 = arith.constant 0 : index
    %92 = vector.load %arg5[%c7, %c0_68, %c0_69] : memref<8x128x32xbf16, #tpu.memory_space<vmem>>, vector<1x128x32xbf16>
    %93 = vector.shape_cast %92 : vector<1x128x32xbf16> to vector<128x32xbf16>
    %cst_70 = arith.constant dense<0.000000e+00> : vector<2x32xf32>
    %94 = tpu.matmul %91, %93, %cst_70 {dimension_numbers = #tpu.dot_dimension_numbers<[1], [0], [0], [1], [0, 0, 1, 1], [], []>} : vector<2x128xbf16>, vector<128x32xbf16>, vector<2x32xf32> -> vector<2x32xf32>
    %95 = arith.addf %90, %94 : vector<2x32xf32>
    %c0_71 = arith.constant 0 : index
    %c0_72 = arith.constant 0 : index
    %96 = vector.load %arg6[%c0_71, %c0_72] : memref<1x32xf32, #tpu.memory_space<vmem>>, vector<1x32xf32>
    %97 = vector.broadcast %96 : vector<1x32xf32> to vector<2x32xf32>
    %98 = arith.addf %95, %97 : vector<2x32xf32>
    %cst_73 = arith.constant 0.000000e+00 : f32
    %99 = vector.broadcast %cst_73 : f32 to vector<2x32xf32>
    %100 = arith.maximumf %98, %99 : vector<2x32xf32>
    %c0_74 = arith.constant 0 : index
    %c0_75 = arith.constant 0 : index
    %101 = vector.load %arg7[%c0_74, %c0_75] : memref<32x2xf32, #tpu.memory_space<vmem>>, vector<32x2xf32>
    %cst_76 = arith.constant dense<0.000000e+00> : vector<2x2xf32>
    %102 = tpu.matmul %100, %101, %cst_76 {dimension_numbers = #tpu.dot_dimension_numbers<[1], [0], [0], [1], [0, 0, 1, 1], [], []>} : vector<2x32xf32>, vector<32x2xf32>, vector<2x2xf32> -> vector<2x2xf32>
    %c0_77 = arith.constant 0 : index
    %c0_78 = arith.constant 0 : index
    %103 = vector.load %arg8[%c0_77, %c0_78] : memref<1x2xf32, #tpu.memory_space<vmem>>, vector<1x2xf32>
    %104 = vector.broadcast %103 : vector<1x2xf32> to vector<2x2xf32>
    %105 = arith.addf %102, %104 : vector<2x2xf32>
    %c0_79 = arith.constant 0 : index
    %c0_80 = arith.constant 0 : index
    %106 = vector.load %arg9[%c0_79, %c0_80] : memref<2x2xf32, #tpu.memory_space<vmem>>, vector<2x2xf32>
    tpu.vector_store %arg9[%c0_79, %c0_80], %105 {strides = array<i32>} : memref<2x2xf32, #tpu.memory_space<vmem>>, vector<2x2xf32>,
    %107 = vector.extract_strided_slice %105 {offsets = [0, 0], sizes = [2, 1], strides = [1, 1]} : vector<2x2xf32> to vector<2x1xf32>
    %108 = vector.extract_strided_slice %105 {offsets = [0, 1], sizes = [2, 1], strides = [1, 1]} : vector<2x2xf32> to vector<2x1xf32>
    %109 = arith.cmpf oge, %107, %108 : vector<2x1xf32>
    %110 = arith.extui %109 : vector<2x1xi1> to vector<2x1xi32>
    %111 = arith.sitofp %110 : vector<2x1xi32> to vector<2x1xf32>
    %112 = tpu.iota {dimensions = array<i32: 1>} : vector<2x2xi32>
    %c0_i32 = arith.constant 0 : i32
    %113 = vector.broadcast %c0_i32 : i32 to vector<2x2xi32>
    %114 = arith.cmpi eq, %112, %113 : vector<2x2xi32>
    %cst_81 = arith.constant 1.000000e+00 : f32
    %115 = vector.broadcast %cst_81 : f32 to vector<2x1xf32>
    %116 = arith.subf %115, %111 : vector<2x1xf32>
    %117 = vector.shape_cast %111 : vector<2x1xf32> to vector<2x1xf32>
    %118 = vector.broadcast %117 : vector<2x1xf32> to vector<2x2xf32>
    %119 = vector.shape_cast %116 : vector<2x1xf32> to vector<2x1xf32>
    %120 = vector.broadcast %119 : vector<2x1xf32> to vector<2x2xf32>
    %121 = arith.select %114, %118, %120 : vector<2x2xi1>, vector<2x2xf32>
    %c0_82 = arith.constant 0 : index
    %c0_83 = arith.constant 0 : index
    %122 = vector.load %arg10[%c0_82, %c0_83] : memref<2x2xf32, #tpu.memory_space<vmem>>, vector<2x2xf32>
    tpu.vector_store %arg10[%c0_82, %c0_83], %121 {strides = array<i32>} : memref<2x2xf32, #tpu.memory_space<vmem>>, vector<2x2xf32>,
    return
  }
}

</mosaic_0001>

<bundles_post_ra>
// kernel: get_optim_action.1
= control target key start
LH: loop header
LB: loop body
LE: loop exit
PB: predicated region body
PF: predicated region fallthrough
CT: control target
= control target key end

     0   :  { %16 = vsyncpa [#allocation4], 0  ;;  %v2753_v1 = vmov 0.0   ;;  %vm2754_vm0 = vmmov 0   ;;  %vm94_vm1 = vcmask 523264   ;;  %s3352_s0 = inlined_call_operand.vmem [shape: f32[38,64], index: 0, kind: input, shape index: {}]   ;;  %s3353_s1 = inlined_call_operand.vmem [shape: bf16[3,64,128], index: 1, kind: input, shape index: {}]   ;;  %s3354_s2 = inlined_call_operand.vmem [shape: f32[1,128], index: 2, kind: input, shape index: {}]   ;;  %s3355_s3 = inlined_call_operand.vmem [shape: bf16[3,128,128], index: 3, kind: input, shape index: {}]   ;;  %s3356_s4 = inlined_call_operand.vmem [shape: f32[1,128], index: 4, kind: input, shape index: {}]   ;;  %s3357_s5 = inlined_call_operand.vmem [shape: bf16[8,128,32], index: 5, kind: input, shape index: {}]   ;;  %s3358_s6 = inlined_call_operand.vmem [shape: f32[1,32], index: 6, kind: input, shape index: {}]   ;;  %s3359_s7 = inlined_call_operand.vmem [shape: f32[32,2], index: 7, kind: input, shape index: {}]   ;;  %s3360_s8 = inlined_call_operand.vmem [shape: f32[1,2], index: 8, kind: input, shape index: {}]   ;;  %s3361_s9 = inlined_call_operand.hbm [shape: f32[2,2], index: 9, kind: output, shape index: {0}]   ;;  %s3362_s10 = inlined_call_operand.hbm [shape: f32[2,2], index: 10, kind: output, shape index: {1}]  }
   0x1   :  { %v2598_v0 = vld [vmem:[%s3353_s1 + $0x20] sm:$0xff]   ;;  %2284 = vmatprep.subr.bf16.mxu0 %v2753_v1  ;;  %2304 = vmatprep.subr.bf16.mxu1 %v2753_v1  ;;  %v2600_v3 = vld [vmem:[%s3353_s1 + $0x28] sm:$0xff]   ;;  %v2602_v5 = vld [vmem:[%s3353_s1 + $0x30] sm:$0xff]  }
   0x2   :  { %v2599_v2 = vld [vmem:[%s3353_s1] sm:$0xff]   ;;  %2285 = vmatpush3.bf16.msra.mxu0 %v2598_v0  ;;  %2292 = vmatprep.mubr.msk.bf16.mxu0 %vm2754_vm0, %v2753_v1  ;;  %v2601_v4 = vld [vmem:[%s3353_s1 + $0x8] sm:$0xff]   ;;  %v2603_v6 = vld [vmem:[%s3353_s1 + $0x10] sm:$0xff]  }
   0x3   :  { %2305 = vmatpush3.bf16.msra.mxu1 %v2599_v2  ;;  %2286 = vmatprep.subr.bf16.mxu0 %v2753_v1  ;;  %v2604_v7 = vld [vmem:[%s3353_s1 + $0x38] sm:$0xff]   ;;  %v53_v8 = vld [vmem:[%s3352_s0 + $0x2] sm:$0xff]  ;;  %v54_v9 = vld [vmem:[%s3352_s0 + $0xa] sm:$0xff] }
   0x4   :  { %2306 = vmatprep.subr.bf16.mxu1 %v2753_v1  ;;  %2312 = vmatprep.mubr.msk.bf16.mxu1 %vm2754_vm0, %v2753_v1  ;;  %v2605_v10 = vld [vmem:[%s3353_s1 + $0x18] sm:$0xff]   ;;  %v37_v11 = vld [vmem:[%s3352_s0] sm:$0xff]  ;;  %v38_v12 = vld [vmem:[%s3352_s0 + $0x8] sm:$0xff]  ;;  %v58_v13 = vpack.c.bf16 %v54_v9, %v53_v8 }
   0x5   :  { %v42_v14 = vpack.c.bf16 %v38_v12, %v37_v11  ;;  %v2606_v15 = vld [vmem:[%s3353_s1 + $0x40] sm:$0xff]   ;;  %v2607_v16 = vld [vmem:[%s3353_s1 + $0x48] sm:$0xff]   ;;  %v55_v17 = vld [vmem:[%s3352_s0 + $0x12] sm:$0xff] }
   0x6   :  { %2287 = vmatpush3.bf16.msra.mxu0 %v2600_v3  ;;  %v56_v18 = vld [vmem:[%s3352_s0 + $0x1a] sm:$0xff]  ;;  %v39_v19 = vld [vmem:[%s3352_s0 + $0x10] sm:$0xff]  ;;  %v57_v24 = vld [vmem:[%s3352_s0 + $0x22] sm:$0x3] }
   0x7   :  { %2307 = vmatpush3.bf16.msra.mxu1 %v2601_v4  ;;  %2288 = vmatprep.subr.bf16.mxu0 %v2753_v1  ;;  %v40_v20 = vld [vmem:[%s3352_s0 + $0x18] sm:$0xff]  ;;  %v2608_v21 = vld [vmem:[%s3353_s1 + $0x50] sm:$0xff]   ;;  %v59_v22 = vpack.c.bf16 %v56_v18, %v55_v17  ;;  %v41_v26 = vld [vmem:[%s3352_s0 + $0x20] sm:$0x3]  ;;  %v60_v27 = vpack.c.bf16 %v57_v24, %v57_v24 }
   0x8   :  { %2308 = vmatprep.subr.bf16.mxu1 %v2753_v1  ;;  %v43_v23 = vpack.c.bf16 %v40_v20, %v39_v19  ;;  %v2609_v25 = vld [vmem:[%s3353_s1 + $0x58] sm:$0xff]   ;;  %v44_v28 = vpack.c.bf16 %v41_v26, %v41_v26  ;;  %v249_v29 = vld [vmem:[%s3352_s0 + $0x4] sm:$0xff]  ;;  %v250_v30 = vld [vmem:[%s3352_s0 + $0xc] sm:$0xff] }
   0x9   :  { %v254_v31 = vpack.c.bf16 %v250_v30, %v249_v29  ;;  %v251_v32 = vld [vmem:[%s3352_s0 + $0x14] sm:$0xff]  ;;  %v252_v33 = vld [vmem:[%s3352_s0 + $0x1c] sm:$0xff]  ;;  %v253_v35 = vld [vmem:[%s3352_s0 + $0x24] sm:$0x3] }
   0xa   :  { %2289 = vmatpush3.bf16.msra.mxu0 %v2602_v5  ;;  %v255_v34 = vpack.c.bf16 %v252_v33, %v251_v32  ;;  %v256_v36 = vpack.c.bf16 %v253_v35, %v253_v35 }
   0xb   :  { %2309 = vmatpush3.bf16.msra.mxu1 %v2603_v6  ;;  %2290 = vmatprep.subr.bf16.mxu0 %v2753_v1 }
   0xc   :  { %2310 = vmatprep.subr.bf16.mxu1 %v2753_v1 }
   0xe   :  { %2291 = vmatpush3.bf16.msra.mxu0 %v2604_v7 }
   0xf   :  { %2311 = vmatpush3.bf16.msra.mxu1 %v2605_v10  ;;  %2324 = vmatprep.subr.bf16.mxu0 %v2753_v1 }
  0x11   :  { %2293 = vmatmul.mubr.msk.bf16.vlgmr.msra.gmra.mrb[0].mxu0 %vm94_vm1, %v58_v13 }
  0x12   :  { %2313 = vmatmul.mubr.msk.bf16.vlgmr.msra.gmra.mrb[0].mxu1 %vm94_vm1, %v42_v14  ;;  %2325 = vmatpush3.bf16.msra.mxu0 %v2606_v15 }
  0x13   :  { %2326 = vmatprep.subr.bf16.mxu0 %v2753_v1  ;;  %2296 = vmatprep.mubr.msk.bf16.mxu0 %vm2754_vm0, %v2753_v1 }
  0x14   :  { %2316 = vmatprep.mubr.msk.bf16.mxu1 %vm2754_vm0, %v2753_v1 }
  0x16   :  { %2327 = vmatpush3.bf16.msra.mxu0 %v2607_v16 }
  0x17   :  { %2328 = vmatprep.subr.bf16.mxu0 %v2753_v1 }
  0x19   :  { %2297 = vmatmul.mubr.msk.bf16.gmra.mrb[4].mxu0 %vm94_vm1, %v59_v22 }
  0x1a   :  { %2317 = vmatmul.mubr.msk.bf16.gmra.mrb[4].mxu1 %vm94_vm1, %v43_v23  ;;  %2329 = vmatpush3.bf16.msra.mxu0 %v2608_v21 }
  0x1b   :  { %2300 = vmatprep.mubr.msk.bf16.mxu0 %vm2754_vm0, %v2753_v1  ;;  %2320 = vmatprep.mubr.msk.bf16.mxu1 %vm2754_vm0, %v2753_v1 }
  0x1c   :  { %2330 = vmatprep.subr.bf16.mxu0 %v2753_v1 }
  0x1e   :  { %2331 = vmatpush3.bf16.msra.mxu0 %v2609_v25 }
  0x1f   :  { %2404 = vmatprep.subr.bf16.mxu0 %v2753_v1 }
  0x21   :  { %2301 = vmatmul.mubr.msk.bf16.gmra.mrb[8].mxu0 %vm94_vm1, %v60_v27 }
  0x22   :  { %2321 = vmatmul.mubr.msk.bf16.gmra.mrb[8].mxu1 %vm94_vm1, %v44_v28  ;;  %2332 = vmatprep.mubr.msk.bf16.mxu0 %vm2754_vm0, %v2753_v1 }
  0x29   :  { %2333 = vmatmul.mubr.msk.bf16.vlgmr.msra.gmra.mrb[12].mxu0 %vm94_vm1, %v254_v31 }
  0x2a   :  { %2336 = vmatprep.mubr.msk.bf16.mxu0 %vm2754_vm0, %v2753_v1 }
  0x31   :  { %2337 = vmatmul.mubr.msk.bf16.gmra.mrb[16].mxu0 %vm94_vm1, %v255_v34 }
  0x32   :  { %2340 = vmatprep.mubr.msk.bf16.mxu0 %vm2754_vm0, %v2753_v1 }
  0x39   :  { %2341 = vmatmul.mubr.msk.bf16.gmra.mrb[20].mxu0 %vm94_vm1, %v256_v36 }
  0x3a   :  { %2420 = vmatprep.mubr.msk.bf16.mxu0 %vm2754_vm0, %v2753_v1 }
  0x3b   :  { %17 = vsyncpa [#allocation6], 0  ;;  %v2610_v37 = vld [vmem:[%s3355_s3 + $0x40] sm:$0xff]   ;;  %v2611_v38 = vld [vmem:[%s3355_s3 + $0x48] sm:$0xff]   ;;  %v360_v16 = vlaneseq  ;;  %vm478_vm3 = vcmask 1046528   ;;  %vm721_vm4 = vcmask 1045504  }
  0x3c   :  { %2344 = vmatprep.subr.bf16.mxu1 %v2610_v37  ;;  %v2612_v39 = vld [vmem:[%s3355_s3 + $0x50] sm:$0xff]   ;;  %v2613_v40 = vld [vmem:[%s3355_s3 + $0x58] sm:$0xff]   ;;  %v2614_v41 = vld [vmem:[%s3355_s3 + $0x60] sm:$0xff]   ;;  %vm1726_vm5 = vcmask 261120   ;;  %vm1800_vm6 = vcmask 9216   ;;  %s2757_s22 = smov 127  }
  0x3d   :  { %2345 = vmatpush3.bf16.msra.mxu1 %v2610_v37  ;;  %v2615_v42 = vld [vmem:[%s3355_s3 + $0x68] sm:$0xff]   ;;  %v2616_v43 = vld [vmem:[%s3355_s3 + $0x70] sm:$0xff]   ;;  %v2617_v44 = vld [vmem:[%s3355_s3 + $0x78] sm:$0xff]   ;;  %v361_v19 = vshrl.u32 %v360_v16, 7 }
  0x3e   :  { %2346 = vmatprep.subr.bf16.mxu1 %v2611_v38  ;;  %v2965_v45 = vld [vmem:[%s3355_s3] sm:$0xff]   ;;  %v2643_v47 = vld [vmem:[%s3357_s5 + $0x48] sm:$0xff]   ;;  %v2645_v48 = vld [vmem:[%s3357_s5 + $0x50] sm:$0xff]  }
  0x3f   :  { %v2641_v46 = vld [vmem:[%s3357_s5 + $0x40] sm:$0xff]   ;;  %v2647_v57 = vld [vmem:[%s3357_s5 + $0x58] sm:$0xff]   ;;  %vm366_vm2 = vcmp.ge.s32.totalorder %v361_v19, 2  ;;  %v2637_v19 = vld [vmem:[%s3355_s3 + $0xa8] sm:$0xff]  }
  0x40   :  { %2405 = vmatpush3.bf16.msra.mxu0 %v2641_v46  ;;  %v2649_v60 = vld [vmem:[%s3357_s5 + $0x60] sm:$0xff]  }
  0x41   :  { %2347 = vmatpush3.bf16.msra.mxu1 %v2611_v38  ;;  %2406 = vmatprep.subr.bf16.mxu0 %v2753_v1  ;;  %v1890_v20 = vld [vmem:[%s3354_s2] ss:$0 sm:$0xff] }
  0x42   :  { %2348 = vmatprep.subr.bf16.mxu1 %v2612_v39 }
  0x44   :  { %2407 = vmatpush3.bf16.msra.mxu0 %v2643_v47 }
  0x45   :  { %2349 = vmatpush3.bf16.msra.mxu1 %v2612_v39  ;;  %2408 = vmatprep.subr.bf16.mxu0 %v2753_v1 }
  0x46   :  { %2350 = vmatprep.subr.bf16.mxu1 %v2613_v40 }
  0x48   :  { %2409 = vmatpush3.bf16.msra.mxu0 %v2645_v48 }
  0x49   :  { %2351 = vmatpush3.bf16.msra.mxu1 %v2613_v40  ;;  %2410 = vmatprep.subr.bf16.mxu0 %v2753_v1 }
  0x4a   :  { %2352 = vmatprep.subr.bf16.mxu1 %v2614_v41 }
  0x4c   :  { %2411 = vmatpush3.bf16.msra.mxu0 %v2647_v57 }
  0x4d   :  { %2353 = vmatpush3.bf16.msra.mxu1 %v2614_v41  ;;  %2412 = vmatprep.subr.bf16.mxu0 %v2753_v1 }
  0x4e   :  { %2354 = vmatprep.subr.bf16.mxu1 %v2615_v42 }
  0x50   :  { %2413 = vmatpush3.bf16.msra.mxu0 %v2649_v60 }
  0x51   :  { %2355 = vmatpush3.bf16.msra.mxu1 %v2615_v42  ;;  %2414 = vmatprep.subr.bf16.mxu0 %v2753_v1 }
  0x52   :  { %2356 = vmatprep.subr.bf16.mxu1 %v2616_v43 }
  0x55   :  { %2357 = vmatpush3.bf16.msra.mxu1 %v2616_v43 }
  0x56   :  { %2358 = vmatprep.subr.bf16.mxu1 %v2617_v44 }
  0x59   :  { %2359 = vmatpush3.bf16.msra.mxu1 %v2617_v44 }
  0x5a   :  { %2364 = vmatprep.subr.bf16.mxu1 %v2965_v45 }
  0xe4   :  { %v138_v49 = vpop.f32.mrb[0].mxu0 }
  0xe5   :  { %v227_v50 = vpop.f32.mrb[0].mxu1  ;;  %v2294_v51 = vpop.f32.mrb[1].mxu0 }
  0xe6   :  { %v228_v52 = vadd.f32 %v227_v50, %v138_v49  ;;  %v2314_v53 = vpop.f32.mrb[1].mxu1  ;;  %v141_v54 = vpop.f32.mrb[2].mxu0 }
  0xe7   :  { %v230_v55 = vpop.f32.mrb[2].mxu1  ;;  %v2295_v56 = vpop.f32.mrb[3].mxu0 }
  0xe8   :  { %v231_v58 = vadd.f32 %v230_v55, %v141_v54  ;;  %v2315_v59 = vpop.f32.mrb[3].mxu1 }
  0xec   :  { %v146_v61 = vpop.f32.mrb[4].mxu0 }
  0xed   :  { %v235_v62 = vpop.f32.mrb[4].mxu1  ;;  %v2298_v63 = vpop.f32.mrb[5].mxu0 }
  0xee   :  { %v236_v0 = vadd.f32 %v235_v62, %v146_v61  ;;  %v2318_v2 = vpop.f32.mrb[5].mxu1  ;;  %v149_v3 = vpop.f32.mrb[6].mxu0  ;;  %v2622_v62 = vld [vmem:[%s3355_s3 + $0x8] sm:$0xff]  }
  0xef   :  { %v238_v4 = vpop.f32.mrb[6].mxu1  ;;  %v2299_v5 = vpop.f32.mrb[7].mxu0  ;;  %v2624_v2 = vld [vmem:[%s3355_s3 + $0x18] sm:$0xff]  }
  0xf0   :  { %v239_v6 = vadd.f32 %v238_v4, %v149_v3  ;;  %v2319_v7 = vpop.f32.mrb[7].mxu1  ;;  %v2625_v3 = vld [vmem:[%s3355_s3 + $0x20] sm:$0xff]   ;;  %v2627_v4 = vld [vmem:[%s3355_s3 + $0x30] sm:$0xff]   ;;  %v2628_v5 = vld [vmem:[%s3355_s3 + $0x38] sm:$0xff]  }
  0xf1   :  { %v2630_v7 = vld [vmem:[%s3355_s3 + $0x80] sm:$0xff]  }
  0xf4   :  { %v154_v8 = vpop.f32.mrb[8].mxu0 }
  0xf5   :  { %v2302_v9 = vpop.f32.mrb[9].mxu0  ;;  %v243_v10 = vpop.f32.mrb[8].mxu1 }
  0xf6   :  { %v244_v11 = vadd.f32 %v243_v10, %v154_v8  ;;  %v157_v12 = vpop.f32.mrb[10].mxu0  ;;  %v2322_v13 = vpop.f32.mrb[9].mxu1 }
  0xf7   :  { %v2303_v14 = vpop.f32.mrb[11].mxu0  ;;  %v246_v15 = vpop.f32.mrb[10].mxu1  ;;  %v2633_v13 = vld [vmem:[%s3355_s3 + $0x88] sm:$0xff]  }
  0xf8   :  { %v2323_v17 = vpop.f32.mrb[11].mxu1  ;;  %v2634_v15 = vld [vmem:[%s3355_s3 + $0x90] sm:$0xff]  }
  0xf9   :  { %v2635_v17 = vld [vmem:[%s3355_s3 + $0x98] sm:$0xff]  }
  0xfc   :  { %v333_v18 = vpop.f32.mrb[12].mxu0 }
  0xfd   :  { %v355_v21 = vadd.f32 %v333_v18, %v228_v52  ;;  %v2334_v22 = vpop.f32.mrb[13].mxu0  ;;  %v2636_v18 = vld [vmem:[%s3355_s3 + $0xa0] sm:$0xff]  }
  0xfe   :  { %v336_v23 = vpop.f32.mrb[14].mxu0 }
  0xff   :  { %v378_v24 = vadd.f32 %v1890_v20, %v355_v21  ;;  %v356_v25 = vadd.f32 %v336_v23, %v231_v58  ;;  %v2335_v26 = vpop.f32.mrb[15].mxu0  ;;  %v2639_v21 = vld [vmem:[%s3355_s3 + $0xb8] sm:$0xff]  }
 0x100   :  { %v2644_v26 = vld [vmem:[%s3357_s5 + $0xc8] sm:$0xff]  }
 0x101   :  { %v383_v27 = vmax.f32 %v378_v24, 0.0  ;;  %v379_v28 = vadd.f32 %v1890_v20, %v356_v25  ;;  %v2642_v24 = vld [vmem:[%s3357_s5 + $0xc0] sm:$0xff]  }
 0x103   :  { %v398_v29 = vsel %vm366_vm2, %v383_v27, 0.0  ;;  %v384_v30 = vmax.f32 %v379_v28, 0.0  ;;  %v2646_v27 = vld [vmem:[%s3357_s5 + $0xd0] sm:$0xff]   ;;  %v2648_v28 = vld [vmem:[%s3357_s5 + $0xd8] sm:$0xff]  }
 0x104   :  { %v341_v31 = vpop.f32.mrb[16].mxu0 }
 0x105   :  { %v2148_v32 = vpack.c.bf16 %v384_v30, %v398_v29  ;;  %v357_v33 = vadd.f32 %v341_v31, %v236_v0  ;;  %v2338_v34 = vpop.f32.mrb[17].mxu0  ;;  %v2623_v0 = vld [vmem:[%s3355_s3 + $0x10] sm:$0xff]   ;;  %v2650_v29 = vld [vmem:[%s3357_s5 + $0xe0] sm:$0xff]   ;;  %v2651_v30 = vld [vmem:[%s3357_s5 + $0x68] sm:$0xff]  }
 0x106   :  { %v344_v35 = vpop.f32.mrb[18].mxu0  ;;  %v2652_v31 = vld [vmem:[%s3357_s5 + $0xe8] sm:$0xff]   ;;  %2415 = vmatpush3.bf16.msra.mxu0 %v2651_v30  ;;  %v2655_v34 = vld [vmem:[%s3357_s5 + $0x78] sm:$0xff]   ;;  %v2693_v30 = vld [vmem:[%s3357_s5 + $0x120] sm:$0xff]  }
 0x107   :  { %2149 = vst [vmem:[#allocation2] sm:$0xff] %v2148_v32   ;;  %v380_v36 = vadd.f32 %v1890_v20, %v357_v33  ;;  %v358_v37 = vadd.f32 %v344_v35, %v239_v6  ;;  %v2339_v38 = vpop.f32.mrb[19].mxu0  ;;  %2416 = vmatprep.subr.bf16.mxu0 %v2753_v1  ;;  %v2653_v32 = vld [vmem:[%s3357_s5 + $0x70] sm:$0xff]   ;;  %v2656_v35 = vld [vmem:[%s3357_s5 + $0xf8] sm:$0xff]  }
 0x108   :  { %v2654_v33 = vld [vmem:[%s3357_s5 + $0xf0] sm:$0xff]  }
 0x109   :  { %v381_v39 = vadd.f32 %v1890_v20, %v358_v37  ;;  %v385_v40 = vmax.f32 %v380_v36, 0.0  ;;  %v1959_v36 = vld [vmem:[%s3356_s4] ss:$0 sm:$0xff] }
 0x10a   :  { %2417 = vmatpush3.bf16.msra.mxu0 %v2653_v32  ;;  %v2695_v32 = vld [vmem:[%s3357_s5 + $0x130] sm:$0xff]  }
 0x10b   :  { %v386_v41 = vmax.f32 %v381_v39, 0.0  ;;  %2418 = vmatprep.subr.bf16.mxu0 %v2753_v1 }
 0x10c   :  { %v349_v42 = vpop.f32.mrb[20].mxu0 }
 0x10d   :  { %v2153_v43 = vpack.c.bf16 %v386_v41, %v385_v40  ;;  %v359_v44 = vadd.f32 %v349_v42, %v244_v11  ;;  %v2342_v46 = vpop.f32.mrb[21].mxu0 }
 0x10e   :  { %v352_v48 = vpop.f32.mrb[22].mxu0  ;;  %v430_v51 = vld [vmem:[#allocation2 + $0x4] sm:$0xf]  ;;  %v449_v52 = vld [vmem:[#allocation2] sm:$0xe]  ;;  %2419 = vmatpush3.bf16.msra.mxu0 %v2655_v34 }
 0x10f   :  { %2155 = vst [vmem:[#allocation2 + $0x8] sm:$0xff] %v2153_v43   ;;  %v382_v47 = vadd.f32 %v1890_v20, %v359_v44  ;;  %v2343_v50 = vpop.f32.mrb[23].mxu0  ;;  %v1912_v54 = vcombine.low %v449_v52, %v430_v51  ;;  %v429_v60 = vld [vmem:[#allocation2] sm:$0xf]  ;;  %v2638_v20 = vld [vmem:[%s3355_s3 + $0xb0] sm:$0xff]   ;;  %2424 = vmatprep.subr.bf16.mxu0 %v2753_v1 }
 0x110   :  { %v1922_v63 = vcombine.low %v429_v60, %v430_v51  ;;  %v2631_v8 = vld [vmem:[#allocation2] sm:$0xfc]   ;;  %v2663_v60 = vld [vmem:[%s3357_s5 + $0x18] sm:$0xff]  }
 0x111   :  { %v387_v49 = vmax.f32 %v382_v47, 0.0  ;;  %v479_v58 = vrot.slane %v1912_v54, 1  ;;  %v722_v12 = vrot.slane %v2631_v8, 2  ;;  %v2657_v52 = vld [vmem:[%s3357_s5] sm:$0xff]  }
 0x112   :  { %v2697_v34 = vld [vmem:[%s3357_s5 + $0x180] sm:$0xff]  }
 0x113   :  { %v2144_v53 = vpack.c.bf16 %v387_v49, %v387_v49 }
 0x115   :  { %428 = vst [vmem:[#allocation2 + $0x10] sm:$0x1] %v2144_v53  ;;  %v2658_v53 = vld [vmem:[%s3357_s5 + $0x140] sm:$0xff]  }
 0x116   :  { %v431_v55 = vld [vmem:[#allocation2 + $0x8] sm:$0xf]  ;;  %v450_v56 = vld [vmem:[#allocation2 + $0xc] sm:$0xf] }
 0x117   :  { %v1913_v57 = vcombine.low %v431_v55, %v450_v56  ;;  %v2632_v6 = vld [vmem:[#allocation2 + $0x8] sm:$0xff]  }
 0x118   :  { %v432_v9 = vld [vmem:[#allocation2 + $0xc] sm:$0x7]  ;;  %v723_v10 = vrot.slane %v2632_v6, 2  ;;  %v2673_v6 = vld [vmem:[%s3357_s5 + $0x80] sm:$0xff]  }
 0x119   :  { %v480_v59 = vrot.slane %v1913_v57, 1  ;;  %v1923_v11 = vcombine.low %v431_v55, %v432_v9  ;;  %v2659_v56 = vld [vmem:[%s3357_s5 + $0x8] sm:$0xff]  }
 0x11a   :  { %v724_v14 = vsel %vm721_vm4, %v722_v12, %v723_v10  ;;  %v2660_v57 = vld [vmem:[%s3357_s5 + $0x148] sm:$0xff]   ;;  %v2678_v12 = vld [vmem:[%s3357_s5 + $0x1d0] sm:$0xff]  }
 0x11b   :  { %v481_v61 = vsel %vm478_vm3, %v479_v58, %v480_v59  ;;  %v2661_v58 = vld [vmem:[%s3357_s5 + $0x10] sm:$0xff]   ;;  %v2675_v9 = vld [vmem:[%s3357_s5 + $0x88] sm:$0xff]  }
 0x11c   :  { %2360 = vmatprep.mubr.bf16.mxu1 %v481_v61  ;;  %v2640_v22 = vld [vmem:[#allocation2 + $0x10] ss:$0 sps:$4 sm:$0x11]   ;;  %v2664_v61 = vld [vmem:[%s3357_s5 + $0x158] sm:$0xff]  }
 0x11d   :  { %2361 = vmatmul.mubr.bf16.vlgmr.msra.gmra.mrb[12].mxu1 %v480_v59  ;;  %v725_v23 = vrot.slane %v2640_v22, 2  ;;  %v2662_v59 = vld [vmem:[%s3357_s5 + $0x150] sm:$0xff]   ;;  %v2687_v22 = vld [vmem:[%s3357_s5 + $0xb8] sm:$0xff]  }
 0x11e   :  { %2365 = vmatpush3.bf16.msra.mxu1 %v2965_v45  ;;  %2380 = vmatprep.mubr.bf16.mxu1 %v1922_v63  ;;  %v2626_v45 = vld [vmem:[%s3355_s3 + $0x28] sm:$0xff]   ;;  %v2666_v63 = vld [vmem:[%s3357_s5 + $0x160] sm:$0xff]  }
 0x11f   :  { %2366 = vmatprep.subr.bf16.mxu1 %v2622_v62  ;;  %v726_v25 = vsel %vm721_vm4, %v723_v10, %v725_v23  ;;  %v2676_v10 = vld [vmem:[%s3357_s5 + $0x1c8] sm:$0xff]   ;;  %v2688_v23 = vld [vmem:[%s3357_s5 + $0x1f8] sm:$0xff]  }
 0x122   :  { %2367 = vmatpush3.bf16.msra.mxu1 %v2622_v62  ;;  %v2665_v62 = vld [vmem:[%s3357_s5 + $0x20] sm:$0xff]  }
 0x123   :  { %2368 = vmatprep.subr.bf16.mxu1 %v2623_v0 }
 0x126   :  { %2369 = vmatpush3.bf16.msra.mxu1 %v2623_v0  ;;  %v2667_v0 = vld [vmem:[%s3357_s5 + $0x28] sm:$0xff]  }
 0x127   :  { %2370 = vmatprep.subr.bf16.mxu1 %v2624_v2 }
 0x12a   :  { %2371 = vmatpush3.bf16.msra.mxu1 %v2624_v2  ;;  %v2668_v2 = vld [vmem:[%s3357_s5 + $0x168] sm:$0xff]  }
 0x12b   :  { %2372 = vmatprep.subr.bf16.mxu1 %v2625_v3 }
 0x12e   :  { %2373 = vmatpush3.bf16.msra.mxu1 %v2625_v3  ;;  %v2669_v3 = vld [vmem:[%s3357_s5 + $0x30] sm:$0xff]  }
 0x12f   :  { %2374 = vmatprep.subr.bf16.mxu1 %v2626_v45 }
 0x132   :  { %2375 = vmatpush3.bf16.msra.mxu1 %v2626_v45  ;;  %v2670_v45 = vld [vmem:[%s3357_s5 + $0x170] sm:$0xff]  }
 0x133   :  { %2376 = vmatprep.subr.bf16.mxu1 %v2627_v4 }
 0x136   :  { %2377 = vmatpush3.bf16.msra.mxu1 %v2627_v4  ;;  %v2671_v4 = vld [vmem:[%s3357_s5 + $0x38] sm:$0xff]  }
 0x137   :  { %2378 = vmatprep.subr.bf16.mxu1 %v2628_v5 }
 0x13a   :  { %2379 = vmatpush3.bf16.msra.mxu1 %v2628_v5  ;;  %v2672_v5 = vld [vmem:[%s3357_s5 + $0x178] sm:$0xff]  }
 0x13b   :  { %2384 = vmatprep.subr.bf16.mxu1 %v2630_v7 }
 0x13d   :  { %2381 = vmatmul.mubr.bf16.vlgmr.msra.gmra.mrb[12].mxu1 %v1923_v11  ;;  %v2677_v11 = vld [vmem:[%s3357_s5 + $0x90] sm:$0xff]  }
 0x13e   :  { %2385 = vmatpush3.bf16.msra.mxu1 %v2630_v7  ;;  %2400 = vmatprep.mubr.bf16.mxu1 %v724_v14  ;;  %v2674_v7 = vld [vmem:[%s3357_s5 + $0x1c0] sm:$0xff]   ;;  %v2680_v14 = vld [vmem:[%s3357_s5 + $0x1d8] sm:$0xff]  }
 0x13f   :  { %2386 = vmatprep.subr.bf16.mxu1 %v2633_v13 }
 0x142   :  { %2387 = vmatpush3.bf16.msra.mxu1 %v2633_v13  ;;  %v2679_v13 = vld [vmem:[%s3357_s5 + $0x98] sm:$0xff]  }
 0x143   :  { %2388 = vmatprep.subr.bf16.mxu1 %v2634_v15 }
 0x146   :  { %2389 = vmatpush3.bf16.msra.mxu1 %v2634_v15  ;;  %v2681_v15 = vld [vmem:[%s3357_s5 + $0xa0] sm:$0xff]  }
 0x147   :  { %2390 = vmatprep.subr.bf16.mxu1 %v2635_v17 }
 0x14a   :  { %2391 = vmatpush3.bf16.msra.mxu1 %v2635_v17  ;;  %v2682_v17 = vld [vmem:[%s3357_s5 + $0x1e0] sm:$0xff]  }
 0x14b   :  { %2392 = vmatprep.subr.bf16.mxu1 %v2636_v18 }
 0x14e   :  { %2393 = vmatpush3.bf16.msra.mxu1 %v2636_v18  ;;  %v2683_v18 = vld [vmem:[%s3357_s5 + $0xa8] sm:$0xff]  }
 0x14f   :  { %2394 = vmatprep.subr.bf16.mxu1 %v2637_v19 }
 0x152   :  { %2395 = vmatpush3.bf16.msra.mxu1 %v2637_v19  ;;  %v2684_v19 = vld [vmem:[%s3357_s5 + $0x1e8] sm:$0xff]  }
 0x153   :  { %2396 = vmatprep.subr.bf16.mxu1 %v2638_v20 }
 0x156   :  { %2397 = vmatpush3.bf16.msra.mxu1 %v2638_v20  ;;  %v2685_v20 = vld [vmem:[%s3357_s5 + $0xb0] sm:$0xff]  }
 0x157   :  { %2398 = vmatprep.subr.bf16.mxu1 %v2639_v21 }
 0x15a   :  { %2399 = vmatpush3.bf16.msra.mxu1 %v2639_v21  ;;  %v2686_v21 = vld [vmem:[%s3357_s5 + $0x1f0] sm:$0xff]  }
 0x15b   :  { %2464 = vmatprep.subr.bf16.mxu1 %v2753_v1 }
 0x15d   :  { %2401 = vmatmul.mubr.bf16.vlgmr.msra.gmra.mrb[12].mxu1 %v726_v25 }
 0x15e   :  { %2465 = vmatpush3.bf16.msra.mxu1 %v2642_v24  ;;  %2480 = vmatprep.mubr.msk.bf16.mxu1 %vm2754_vm0, %v2753_v1  ;;  %v2689_v24 = vld [vmem:[%s3357_s5 + $0x100] sm:$0xff]  }
 0x15f   :  { %2466 = vmatprep.subr.bf16.mxu1 %v2753_v1 }
 0x162   :  { %2467 = vmatpush3.bf16.msra.mxu1 %v2644_v26 }
 0x163   :  { %2468 = vmatprep.subr.bf16.mxu1 %v2753_v1 }
 0x166   :  { %2469 = vmatpush3.bf16.msra.mxu1 %v2646_v27  ;;  %v2690_v27 = vld [vmem:[%s3357_s5 + $0x108] sm:$0xff]  }
 0x167   :  { %2470 = vmatprep.subr.bf16.mxu1 %v2753_v1 }
 0x16a   :  { %2471 = vmatpush3.bf16.msra.mxu1 %v2648_v28  ;;  %v2691_v28 = vld [vmem:[%s3357_s5 + $0x110] sm:$0xff]  }
 0x16b   :  { %2472 = vmatprep.subr.bf16.mxu1 %v2753_v1 }
 0x16e   :  { %2473 = vmatpush3.bf16.msra.mxu1 %v2650_v29  ;;  %v2692_v29 = vld [vmem:[%s3357_s5 + $0x118] sm:$0xff]  }
 0x16f   :  { %2474 = vmatprep.subr.bf16.mxu1 %v2753_v1 }
 0x172   :  { %2475 = vmatpush3.bf16.msra.mxu1 %v2652_v31  ;;  %v2694_v31 = vld [vmem:[%s3357_s5 + $0x128] sm:$0xff]  }
 0x173   :  { %2476 = vmatprep.subr.bf16.mxu1 %v2753_v1 }
 0x176   :  { %2477 = vmatpush3.bf16.msra.mxu1 %v2654_v33  ;;  %v2696_v33 = vld [vmem:[%s3357_s5 + $0x138] sm:$0xff]  }
 0x177   :  { %2478 = vmatprep.subr.bf16.mxu1 %v2753_v1 }
 0x17a   :  { %2479 = vmatpush3.bf16.msra.mxu1 %v2656_v35  ;;  %v2698_v35 = vld [vmem:[%s3357_s5 + $0x188] sm:$0xff]  }
 0x17b   :  { %2504 = vmatprep.subr.bf16.mxu1 %v2753_v1 }
 0x230   :  { %v2402_v37 = vpop.f32.mrb[12].mxu1 }
 0x231   :  { %v839_v38 = vadd.f32 %v2402_v37, %v1959_v36  ;;  %v811_v39 = vpop.f32.mrb[13].mxu1  ;;  %v2700_v37 = vld [vmem:[%s3357_s5 + $0x198] sm:$0xff]  }
 0x232   :  { %v837_v40 = vadd.f32 %v1959_v36, %v811_v39  ;;  %v2403_v41 = vpop.f32.mrb[14].mxu1  ;;  %v2702_v39 = vld [vmem:[%s3357_s5 + $0x1a8] sm:$0xff]  }
 0x233   :  { %v840_v42 = vadd.f32 %v2403_v41, %v1959_v36  ;;  %v814_v43 = vpop.f32.mrb[15].mxu1  ;;  %v843_v46 = vmax.f32 %v839_v38, 0.0  ;;  %v2701_v38 = vld [vmem:[%s3357_s5 + $0x1a0] sm:$0xff]   ;;  %v2704_v41 = vld [vmem:[%s3357_s5 + $0x1b8] sm:$0xff]  }
 0x234   :  { %v838_v44 = vadd.f32 %v1959_v36, %v814_v43  ;;  %v841_v48 = vmax.f32 %v837_v40, 0.0  ;;  %v2699_v36 = vld [vmem:[%s3357_s5 + $0x190] sm:$0xff]   ;;  %v1715_v43 = vld [vmem:[%s3359_s7] sm:$0xff] }
 0x235   :  { %v844_v47 = vmax.f32 %v840_v42, 0.0  ;;  %v2703_v40 = vld [vmem:[%s3357_s5 + $0x1b0] sm:$0xff]  }
 0x236   :  { %v842_v49 = vmax.f32 %v838_v44, 0.0  ;;  %v1716_v44 = vld [vmem:[%s3359_s7 + $0x8] sm:$0xff] }
 0x237   :  { %v3090_v50 = vpack.c.bf16 %v844_v47, %v843_v46 }
 0x238   :  { %v3092_v51 = vpack.c.bf16 %v842_v49, %v841_v48  ;;  %v2576_v48 = vpack.c.bf16 %v1716_v44, %v1715_v43 }
 0x239   :  { %v1399_v8 = vrot.slane %v3090_v50, 2  ;;  %v1615_v26 = vrot.slane %v3090_v50, 6  ;;  %v1507_v42 = vrot.slane %v3090_v50, 4 }
 0x23a   :  { %v881_v54 = vrot.slane %v3092_v51, 2  ;;  %v1184_v55 = vrot.slane %v3092_v51, 6  ;;  %v1076_v25 = vrot.slane %v3092_v51, 4 }
 0x23c   :  { %2421 = vmatmul.mubr.bf16.vlgmr.msra.gmra.mrb[24].mxu0 %v881_v54  ;;  %2481 = vmatmul.mubr.bf16.vlgmr.msra.gmra.mrb[16].mxu1 %v1184_v55 }
 0x23d   :  { %2425 = vmatpush3.bf16.msra.mxu0 %v2657_v52  ;;  %2505 = vmatpush3.bf16.msra.mxu1 %v2658_v53  ;;  %v2755_v52 = vmov 0.0|0.0  }
 0x23e   :  { %2426 = vmatprep.subr.bf16.mxu0 %v2753_v1  ;;  %2506 = vmatprep.subr.bf16.mxu1 %v2753_v1 }
 0x23f   :  { %2440 = vmatprep.mubr.msk.bf16.mxu0 %vm2754_vm0, %v2753_v1  ;;  %2520 = vmatprep.mubr.msk.bf16.mxu1 %vm2754_vm0, %v2753_v1 }
 0x241   :  { %2427 = vmatpush3.bf16.msra.mxu0 %v2659_v56  ;;  %2507 = vmatpush3.bf16.msra.mxu1 %v2660_v57  ;;  %v1717_v56 = vld [vmem:[%s3359_s7 + $0x10] sm:$0xff]  ;;  %v1718_v57 = vld [vmem:[%s3359_s7 + $0x18] sm:$0xff] }
 0x242   :  { %2428 = vmatprep.subr.bf16.mxu0 %v2753_v1  ;;  %2508 = vmatprep.subr.bf16.mxu1 %v2753_v1 }
 0x245   :  { %2429 = vmatpush3.bf16.msra.mxu0 %v2661_v58  ;;  %2509 = vmatpush3.bf16.msra.mxu1 %v2662_v59  ;;  %v2579_v58 = vpack.c.bf16 %v1718_v57, %v1717_v56 }
 0x246   :  { %2430 = vmatprep.subr.bf16.mxu0 %v2753_v1  ;;  %2510 = vmatprep.subr.bf16.mxu1 %v2753_v1 }
 0x249   :  { %2431 = vmatpush3.bf16.msra.mxu0 %v2663_v60  ;;  %2511 = vmatpush3.bf16.msra.mxu1 %v2664_v61 }
 0x24a   :  { %2432 = vmatprep.subr.bf16.mxu0 %v2753_v1  ;;  %2512 = vmatprep.subr.bf16.mxu1 %v2753_v1 }
 0x24d   :  { %2433 = vmatpush3.bf16.msra.mxu0 %v2665_v62  ;;  %2513 = vmatpush3.bf16.msra.mxu1 %v2666_v63 }
 0x24e   :  { %2434 = vmatprep.subr.bf16.mxu0 %v2753_v1  ;;  %2514 = vmatprep.subr.bf16.mxu1 %v2753_v1 }
 0x251   :  { %2435 = vmatpush3.bf16.msra.mxu0 %v2667_v0  ;;  %2515 = vmatpush3.bf16.msra.mxu1 %v2668_v2 }
 0x252   :  { %2436 = vmatprep.subr.bf16.mxu0 %v2753_v1  ;;  %2516 = vmatprep.subr.bf16.mxu1 %v2753_v1 }
 0x255   :  { %2437 = vmatpush3.bf16.msra.mxu0 %v2669_v3  ;;  %2517 = vmatpush3.bf16.msra.mxu1 %v2670_v45 }
 0x256   :  { %2438 = vmatprep.subr.bf16.mxu0 %v2753_v1  ;;  %2518 = vmatprep.subr.bf16.mxu1 %v2753_v1 }
 0x259   :  { %2439 = vmatpush3.bf16.msra.mxu0 %v2671_v4  ;;  %2519 = vmatpush3.bf16.msra.mxu1 %v2672_v5 }
 0x25a   :  { %2444 = vmatprep.subr.bf16.mxu0 %v2753_v1  ;;  %2544 = vmatprep.subr.bf16.mxu1 %v2753_v1 }
 0x25c   :  { %2441 = vmatmul.mubr.bf16.vlgmr.msra.gmra.mrb[28].mxu0 %v3092_v51  ;;  %2521 = vmatmul.mubr.bf16.vlgmr.msra.gmra.mrb[20].mxu1 %v1399_v8 }
 0x25d   :  { %2445 = vmatpush3.bf16.msra.mxu0 %v2673_v6  ;;  %2545 = vmatpush3.bf16.msra.mxu1 %v2674_v7 }
 0x25e   :  { %2446 = vmatprep.subr.bf16.mxu0 %v2753_v1  ;;  %2546 = vmatprep.subr.bf16.mxu1 %v2753_v1 }
 0x25f   :  { %2460 = vmatprep.mubr.msk.bf16.mxu0 %vm2754_vm0, %v2753_v1  ;;  %2560 = vmatprep.mubr.msk.bf16.mxu1 %vm2754_vm0, %v2753_v1 }
 0x261   :  { %2447 = vmatpush3.bf16.msra.mxu0 %v2675_v9  ;;  %2547 = vmatpush3.bf16.msra.mxu1 %v2676_v10 }
 0x262   :  { %2448 = vmatprep.subr.bf16.mxu0 %v2753_v1  ;;  %2548 = vmatprep.subr.bf16.mxu1 %v2753_v1 }
 0x265   :  { %2449 = vmatpush3.bf16.msra.mxu0 %v2677_v11  ;;  %2549 = vmatpush3.bf16.msra.mxu1 %v2678_v12 }
 0x266   :  { %2450 = vmatprep.subr.bf16.mxu0 %v2753_v1  ;;  %2550 = vmatprep.subr.bf16.mxu1 %v2753_v1 }
 0x269   :  { %2451 = vmatpush3.bf16.msra.mxu0 %v2679_v13  ;;  %2551 = vmatpush3.bf16.msra.mxu1 %v2680_v14 }
 0x26a   :  { %2452 = vmatprep.subr.bf16.mxu0 %v2753_v1  ;;  %2552 = vmatprep.subr.bf16.mxu1 %v2753_v1 }
 0x26d   :  { %2453 = vmatpush3.bf16.msra.mxu0 %v2681_v15  ;;  %2553 = vmatpush3.bf16.msra.mxu1 %v2682_v17 }
 0x26e   :  { %2454 = vmatprep.subr.bf16.mxu0 %v2753_v1  ;;  %2554 = vmatprep.subr.bf16.mxu1 %v2753_v1 }
 0x271   :  { %2455 = vmatpush3.bf16.msra.mxu0 %v2683_v18  ;;  %2555 = vmatpush3.bf16.msra.mxu1 %v2684_v19 }
 0x272   :  { %2456 = vmatprep.subr.bf16.mxu0 %v2753_v1  ;;  %2556 = vmatprep.subr.bf16.mxu1 %v2753_v1 }
 0x275   :  { %2457 = vmatpush3.bf16.msra.mxu0 %v2685_v20  ;;  %2557 = vmatpush3.bf16.msra.mxu1 %v2686_v21 }
 0x276   :  { %2458 = vmatprep.subr.bf16.mxu0 %v2753_v1  ;;  %2558 = vmatprep.subr.bf16.mxu1 %v2753_v1 }
 0x279   :  { %2459 = vmatpush3.bf16.msra.mxu0 %v2687_v22  ;;  %2559 = vmatpush3.bf16.msra.mxu1 %v2688_v23 }
 0x27a   :  { %2484 = vmatprep.subr.bf16.mxu0 %v2753_v1 }
 0x27c   :  { %2461 = vmatmul.mubr.bf16.vlgmr.msra.gmra.mrb[32].mxu0 %v1076_v25  ;;  %2561 = vmatmul.mubr.bf16.vlgmr.msra.gmra.mrb[24].mxu1 %v1615_v26 }
 0x27d   :  { %2485 = vmatpush3.bf16.msra.mxu0 %v2689_v24  ;;  %2500 = vmatprep.mubr.msk.bf16.mxu0 %vm2754_vm0, %v2753_v1  ;;  %v2136_v24 = vld [vmem:[%s3358_s6] ss:$0 sm:$0xff]  ;;  %s2758_s6 = smov [#allocation3]  }
 0x27e   :  { %2486 = vmatprep.subr.bf16.mxu0 %v2753_v1  ;;  %s1831_s23 = sshll.u32 %s2758_s6, 4  ;;  %s1832_s23 = int_to_ptr.vmem [resolvable:$true] %s1831_s23 }
 0x27f   :  { %s2705_s24 = scalar_lea.vmem %s1832_s23, 32  ;;  %p2710_p1 = scmp.lt.s32.totalorder %s1832_s23, %s1832_s23 }
 0x280   :  { %p2706_p0 = scmp.ne.s32.totalorder %s1832_s23, %s2705_s24  ;;  %p2711_p2 = scmp.lt.s32.totalorder %s2705_s24, %s2705_s24 }
 0x281   :  { %2487 = vmatpush3.bf16.msra.mxu0 %v2690_v27 }
 0x282   :  { %2488 = vmatprep.subr.bf16.mxu0 %v2753_v1  ;;  %p2712_p3 = por %p2711_p2, %p2710_p1 }
 0x284   :  { %p2713_p4 = pnand %p2712_p3, %p2706_p0 }
 0x285   :  { %2489 = vmatpush3.bf16.msra.mxu0 %v2691_v28 }
 0x286   :  { %2490 = vmatprep.subr.bf16.mxu0 %v2753_v1 }
 0x289   :  { %2491 = vmatpush3.bf16.msra.mxu0 %v2692_v29 }
 0x28a   :  { %2492 = vmatprep.subr.bf16.mxu0 %v2753_v1 }
 0x28d   :  { %2493 = vmatpush3.bf16.msra.mxu0 %v2693_v30  ;;  %v2756_v30 = vmov 0  }
 0x28e   :  { %2494 = vmatprep.subr.bf16.mxu0 %v2753_v1  ;;  %2596 = vset.pattern.permute.xlu0 %v2756_v30 }
 0x28f   :  { %2597 = vset.pattern.permute.xlu1 %v2756_v30 }
 0x291   :  { %2495 = vmatpush3.bf16.msra.mxu0 %v2694_v31  ;;  %v2137_v31 = vld [vmem:[%s3360_s8] ss:$0 sm:$0xff] }
 0x292   :  { %2496 = vmatprep.subr.bf16.mxu0 %v2753_v1 }
 0x295   :  { %2497 = vmatpush3.bf16.msra.mxu0 %v2695_v32 }
 0x296   :  { %2498 = vmatprep.subr.bf16.mxu0 %v2753_v1 }
 0x299   :  { %2499 = vmatpush3.bf16.msra.mxu0 %v2696_v33 }
 0x29a   :  { %2524 = vmatprep.subr.bf16.mxu0 %v2753_v1 }
 0x29c   :  { %2501 = vmatmul.mubr.bf16.vlgmr.msra.gmra.mrb[36].mxu0 %v3090_v50 }
 0x29d   :  { %2525 = vmatpush3.bf16.msra.mxu0 %v2697_v34  ;;  %2540 = vmatprep.mubr.msk.bf16.mxu0 %vm2754_vm0, %v2753_v1 }
 0x29e   :  { %2526 = vmatprep.subr.bf16.mxu0 %v2753_v1 }
 0x2a1   :  { %2527 = vmatpush3.bf16.msra.mxu0 %v2698_v35 }
 0x2a2   :  { %2528 = vmatprep.subr.bf16.mxu0 %v2753_v1 }
 0x2a5   :  { %2529 = vmatpush3.bf16.msra.mxu0 %v2699_v36 }
 0x2a6   :  { %2530 = vmatprep.subr.bf16.mxu0 %v2753_v1 }
 0x2a9   :  { %2531 = vmatpush3.bf16.msra.mxu0 %v2700_v37 }
 0x2aa   :  { %2532 = vmatprep.subr.bf16.mxu0 %v2753_v1 }
 0x2ad   :  { %2533 = vmatpush3.bf16.msra.mxu0 %v2701_v38 }
 0x2ae   :  { %2534 = vmatprep.subr.bf16.mxu0 %v2753_v1 }
 0x2b1   :  { %2535 = vmatpush3.bf16.msra.mxu0 %v2702_v39 }
 0x2b2   :  { %2536 = vmatprep.subr.bf16.mxu0 %v2753_v1 }
 0x2b5   :  { %2537 = vmatpush3.bf16.msra.mxu0 %v2703_v40 }
 0x2b6   :  { %2538 = vmatprep.subr.bf16.mxu0 %v2753_v1 }
 0x2b9   :  { %2539 = vmatpush3.bf16.msra.mxu0 %v2704_v41 }
 0x2ba   :  { %2575 = vmatprep.subr.bf16.mxu0 %v2755_v52 }
 0x2bc   :  { %2541 = vmatmul.mubr.bf16.vlgmr.msra.gmra.mrb[40].mxu0 %v1507_v42 }
 0x2bd   :  { %2572 = vmatprep.mubr.msk.f32.mxu0 %vm2754_vm0, %v2753_v1  ;;  %2577 = vmatpush3.bf16.msra.mxu0 %v2576_v48 }
 0x2be   :  { %2578 = vmatprep.subr.bf16.mxu0 %v2755_v52 }
 0x2c1   :  { %2580 = vmatpush3.bf16.msra.mxu0 %v2579_v58 }
 0x30f   :  { %v965_v46 = vpop.f32.mrb[24].mxu0  ;;  %v1268_v47 = vpop.f32.mrb[16].mxu1 }
 0x310   :  { %v2422_v49 = vpop.f32.mrb[25].mxu0  ;;  %v2482_v51 = vpop.f32.mrb[17].mxu1 }
 0x311   :  { %v968_v50 = vpop.f32.mrb[26].mxu0  ;;  %v1271_v53 = vpop.f32.mrb[18].mxu1 }
 0x312   :  { %v2423_v54 = vpop.f32.mrb[27].mxu0  ;;  %v2483_v55 = vpop.f32.mrb[19].mxu1 }
 0x32f   :  { %v1053_v59 = vpop.f32.mrb[28].mxu0  ;;  %v1483_v60 = vpop.f32.mrb[20].mxu1 }
 0x330   :  { %v1054_v61 = vadd.f32 %v1053_v59, %v965_v46  ;;  %v2442_v62 = vpop.f32.mrb[29].mxu0  ;;  %v2522_v63 = vpop.f32.mrb[21].mxu1 }
 0x331   :  { %v1056_v0 = vpop.f32.mrb[30].mxu0  ;;  %v1486_v2 = vpop.f32.mrb[22].mxu1 }
 0x332   :  { %v2443_v3 = vpop.f32.mrb[31].mxu0  ;;  %v2523_v45 = vpop.f32.mrb[23].mxu1 }
 0x34f   :  { %v1160_v4 = vpop.f32.mrb[32].mxu0  ;;  %v1699_v5 = vpop.f32.mrb[24].mxu1 }
 0x350   :  { %v1166_v6 = vadd.f32 %v1160_v4, %v1054_v61  ;;  %v2462_v7 = vpop.f32.mrb[33].mxu0  ;;  %v2562_v8 = vpop.f32.mrb[25].mxu1 }
 0x351   :  { %v1163_v9 = vpop.f32.mrb[34].mxu0  ;;  %v1702_v10 = vpop.f32.mrb[26].mxu1 }
 0x352   :  { %v2463_v11 = vpop.f32.mrb[35].mxu0  ;;  %v2563_v12 = vpop.f32.mrb[27].mxu1  ;;  %v1274_v13 = vadd.f32 %v1268_v47, %v1166_v6 }
 0x36f   :  { %v1374_v14 = vpop.f32.mrb[36].mxu0 }
 0x370   :  { %v1380_v15 = vadd.f32 %v1374_v14, %v1274_v13  ;;  %v2502_v17 = vpop.f32.mrb[37].mxu0 }
 0x371   :  { %v1377_v18 = vpop.f32.mrb[38].mxu0 }
 0x372   :  { %v2503_v19 = vpop.f32.mrb[39].mxu0  ;;  %v1489_v20 = vadd.f32 %v1483_v60, %v1380_v15 }
 0x38f   :  { %v1591_v21 = vpop.f32.mrb[40].mxu0 }
 0x390   :  { %v1597_v22 = vadd.f32 %v1591_v21, %v1489_v20  ;;  %v2542_v23 = vpop.f32.mrb[41].mxu0 }
 0x391   :  { %v1594_v25 = vpop.f32.mrb[42].mxu0 }
 0x392   :  { %v1705_v26 = vadd.f32 %v1699_v5, %v1597_v22  ;;  %v2543_v27 = vpop.f32.mrb[43].mxu0 }
 0x394   :  { %v1713_v28 = vadd.f32 %v2136_v24, %v1705_v26 }
 0x396   :  { %v1714_v29 = vmax.f32 %v1713_v28, 0.0 }
 0x398   :  { %2573 = vmatmul.mubr.msk.f32.vlgmr.msra.gmra.mrb[44].mxu0 %vm1726_vm5, %v1714_v29 }
 0x46b   :  { %v1796_v32 = vpop.f32.mrb[44].mxu0 }
 0x46c   :  { %v1797_v33 = vadd.f32 %v2137_v31, %v1796_v32  ;;  %v2574_v34 = vpop.f32.mrb[45].mxu0 }
 0x46e   :  { %1803 = vrot.lane.b32.xlu0 %v1797_v33, %s2757_s22  ;;  %1801 = vst.msk [vmem:[#allocation3] sm:$0x3] %vm1800_vm6, %v1797_v33 }
 0x4e0   :  { %v1804_v35 = vpop.permute.xlu0 %1803 }
 0x4e1   :  { %vm1806_vm7 = vcmp.ge.f32.partialorder %v1797_v33, %v1804_v35 }
 0x4e2   :  { %v2139_v36 = vsel %vm1806_vm7, 1.0, %v2753_v1 }
 0x4e3   :  { %1815 = vperm.xlu0 %2596, %v2139_v36   ;;  %v1812_v37 = vsub.f32 1.0, %v2139_v36 }
 0x4e5   :  { %1820 = vperm.xlu1 %2597, %v1812_v37  }
 0x4e6   :  { %2716 = shalt.err (!%p2713_p4)
}
 0x4e7   :  { %s2717_s26 = scalar_lea.hbm %s3361_s9, 32 }
 0x4e8   :  { %p2718_p5 = scmp.ne.s32.totalorder %s3361_s9, %s2717_s26  ;;  %p2721_p6 = scmp.lt.u32.totalorder %s2717_s26, %s3361_s9 }
 0x4ea   :  { %p2723_p7 = pnand %p2721_p6, %p2718_p5 }
 0x4ec   :  { %2726 = shalt.err (!%p2723_p7)
}
 0x4ed   :  { %1834 = dma.vmem_to_hbm [thread:$0]  %s1832_s23, 32, %s3361_s9, [#allocation4]   ;;  %v1810_v1 = vand.u32 127, %v360_v16 }
 0x4ee   :  { %s2759_s12 = smov [#allocation5]  }
 0x4ef   :  { %s1841_s2 = sshll.u32 %s2759_s12, 4  ;;  %vm1811_vm8 = vcmp.eq.s32.totalorder %v1810_v1, 0  ;;  %s1842_s2 = int_to_ptr.vmem [resolvable:$true] %s1841_s2 }
 0x4f0   :  { %s2727_s13 = scalar_lea.vmem %s1842_s2, 32  ;;  %p2732_p9 = scmp.lt.s32.totalorder %s1842_s2, %s1842_s2 }
 0x4f1   :  { %p2728_p8 = scmp.ne.s32.totalorder %s1842_s2, %s2727_s13  ;;  %p2733_p10 = scmp.lt.s32.totalorder %s2727_s13, %s2727_s13 }
 0x4f3   :  { %p2734_p11 = por %p2733_p10, %p2732_p9 }
 0x4f5   :  { %p2735_p12 = pnand %p2734_p11, %p2728_p8 }
 0x562   :  { %v1816_v38 = vpop.permute.xlu0 %1815 }
 0x564   :  { %v1821_v39 = vpop.permute.xlu1 %1820 }
 0x565   :  { %v1823_v40 = vsel %vm1811_vm8, %v1816_v38, %v1821_v39 }
 0x566   :  { %1824 = vst.msk [vmem:[#allocation5] sm:$0x3] %vm1800_vm6, %v1823_v40 }
 0x567   :  { %2738 = shalt.err (!%p2735_p12)
}
 0x568   :  { %s2739_s15 = scalar_lea.hbm %s3362_s10, 32 }
 0x569   :  { %p2740_p13 = scmp.ne.s32.totalorder %s3362_s10, %s2739_s15  ;;  %p2743_p0 = scmp.lt.u32.totalorder %s2739_s15, %s3362_s10 }
 0x56b   :  { %p2745_p1 = pnand %p2743_p0, %p2740_p13 }
 0x56d   :  { %2748 = shalt.err (!%p2745_p1)
}
 0x56e   :  { %1844 = dma.vmem_to_hbm [thread:$0]  %s1842_s2, 32, %s3362_s10, [#allocation6]  }
 0x56f   :  { %2749 = dma.done.wait [#allocation4], 32  }
 0x570   :  { %2750 = vsyncadd [#allocation4], 4294967264 }
 0x571   :  { %2751 = dma.done.wait [#allocation6], 32  }
 0x572   :  { %2752 = vsyncadd [#allocation6], 4294967264 }
 0x573   :  { %1851 = vsyncpa [#allocation4], 1 }
 0x574   :  { %1852 = vsyncpa [#allocation6], 1 }

</bundles_post_ra>
